<compile_context>
chip_gen: v6e
topology: v6e:2x2x1
jax: 0.10.0
libtpu: 0.0.40
codegen_flags: <defaults>
</compile_context>

<pallas_src>
import functools

import jax
import jax.numpy as jnp
from jax import lax
from jax.experimental import pallas as pl
from jax.experimental.pallas import tpu as pltpu


def _round_up(n, m):
    return ((n + m - 1) // m) * m


def _tile_for(padded_dim, want):
    """Largest multiple of 128 that divides `padded_dim` and is <= `want`."""
    t = max(128, (min(want, padded_dim) // 128) * 128)
    while padded_dim % t != 0:
        t -= 128
    return t


# --------------------------------------------------------------------------
# Kernels
# --------------------------------------------------------------------------

def lr_kernel_resident(x_ref, w_ref, b_ref, o_ref):
    """Fast path: whole weight + bias resident in VMEM (constant index_map ->
    the DMA is elided after the first grid step).  Single K step, so no
    accumulator scratch: write the biased MXU result directly."""
    acc = jnp.dot(
        x_ref[...].astype(w_ref.dtype),
        w_ref[...],
        preferred_element_type=jnp.float32,
    )
    o_ref[...] = (acc + b_ref[...].astype(jnp.float32)).astype(o_ref.dtype)


def lr_kernel_tiled(x_ref, w_ref, b_ref, o_ref, acc_ref, *, d_in, tk):
    """General path: grid = (batch tiles, out tiles, K tiles), K innermost."""
    k = pl.program_id(2)

    @pl.when(k == 0)
    def _():
        acc_ref[...] = jnp.zeros_like(acc_ref)

    x = x_ref[...].astype(w_ref.dtype)
    w = w_ref[...]
    if d_in % tk != 0:
        # Last K block overruns the feature axis: mask the garbage tail of
        # both operands (static check, only emitted when a tail exists).
        limit = d_in - k * tk
        xc = lax.broadcasted_iota(jnp.int32, x.shape, 1)
        x = jnp.where(xc < limit, x, jnp.zeros_like(x))
        wr = lax.broadcasted_iota(jnp.int32, w.shape, 0)
        w = jnp.where(wr < limit, w, jnp.zeros_like(w))

    acc_ref[...] += jnp.dot(x, w, preferred_element_type=jnp.float32)

    @pl.when(k == pl.num_programs(2) - 1)
    def _():
        # Bias added exactly once, at the final reduction step.
        o_ref[...] = (acc_ref[...] + b_ref[...].astype(jnp.float32)).astype(
            o_ref.dtype
        )


# --------------------------------------------------------------------------
# Parameter prep (one-time, NOT in the per-call path)
# --------------------------------------------------------------------------

def prepare_params(weight, bias, *, param_dtype=jnp.bfloat16):
    """weight: (D_out, D_in) in the PyTorch nn.Linear layout.

    Returns (w_t, b_row, d_out) where
      w_t:   (D_in, D_out_p) pre-transposed, output dim zero-padded to a
             multiple of 128 (lane-dense, unmasked stores), bf16 by default.
      b_row: (1, D_out_p) f32.
    """
    d_out, d_in = weight.shape
    d_out_p = _round_up(d_out, 128)

    w_t = weight.T.astype(param_dtype)
    b_row = bias.astype(jnp.float32).reshape(1, d_out)
    if d_out_p != d_out:
        w_t = jnp.pad(w_t, ((0, 0), (0, d_out_p - d_out)))
        b_row = jnp.pad(b_row, ((0, 0), (0, d_out_p - d_out)))
    return w_t, b_row, d_out


# --------------------------------------------------------------------------
# Forward
# --------------------------------------------------------------------------

@functools.partial(jax.jit, static_argnames=("out_features", "tm", "tn", "tk"))
def lr_forward(x, w_t, b_row, *, out_features, tm=512, tn=512, tk=512):
    """y = squeeze(x) @ W.T + b.

    x:     (..., D_in); all leading dims are collapsed into the batch.
           Pass x already in bf16 to get the full bandwidth win (any f32
           input is cast to the weight dtype inside the kernel instead of
           in a separate host-side pass).
    w_t:   (D_in, D_out_p) from prepare_params.
    b_row: (1, D_out_p)    from prepare_params.
    Returns (B, out_features).
    """
    d_in, d_out_p = w_t.shape
    assert x.shape[-1] == d_in, (x.shape, d_in)

    # Explicit "squeeze": collapse everything but the feature axis.  This
    # keeps the batch on the sublane axis even when D_in == 1.
    x2 = x.reshape(-1, d_in)
    b = x2.shape[0]

    # Batch tile: 8-aligned sublanes, big enough to amortize per-step
    # overhead, and at least 2 tiles for large batches (v7x has 2 TCs).
    tm_eff = min(tm, _round_up(b, 8))
    if pl.cdiv(b, tm_eff) == 1 and b > 256:
        tm_eff = _round_up((b + 1) // 2, 8)
    n_bt = pl.cdiv(b, tm_eff)

    x_isz = jnp.dtype(x.dtype).itemsize
    w_isz = jnp.dtype(w_t.dtype).itemsize
    resident_bytes = (
        2 * d_in * d_out_p * w_isz          # weight (conservatively x2)
        + d_out_p * 4                       # bias
        + 2 * tm_eff * d_in * x_isz         # x, double-buffered
        + 2 * tm_eff * d_out_p * x_isz      # out, double-buffered
        + tm_eff * d_out_p * 4              # f32 MXU result tile headroom
    )
    use_resident = resident_bytes <= (20 << 20)

    if use_resident:
        # ---- Fast path: weight resident in VMEM, 1-D grid over batch tiles.
        out_p = pl.pallas_call(
            lr_kernel_resident,
            out_shape=jax.ShapeDtypeStruct((b, d_out_p), x.dtype),
            grid_spec=pltpu.PrefetchScalarGridSpec(
                num_scalar_prefetch=0,
                grid=(n_bt,),
                in_specs=[
                    # Full-extent feature block (== array dim -> exempt from
                    # the 128 rule); partial last batch tile handled by Pallas.
                    pl.BlockSpec((tm_eff, d_in), lambda i: (i, 0)),
                    # Constant index_map -> DMA'd once, stays resident.
                    pl.BlockSpec((d_in, d_out_p), lambda i: (0, 0)),
                    pl.BlockSpec((1, d_out_p), lambda i: (0, 0)),
                ],
                out_specs=pl.BlockSpec((tm_eff, d_out_p), lambda i: (i, 0)),
            ),
            compiler_params=pltpu.CompilerParams(
                dimension_semantics=("parallel",),
                vmem_limit_bytes=32 << 20,
            ),
        )(x2, w_t, b_row)
    else:
        # ---- General path: tiled matmul with K reduction carried in VMEM.
        tn_eff = d_out_p if d_out_p <= 1024 else _tile_for(d_out_p, tn)
        tk_eff = min(tk, _round_up(d_in, 128))
        grid = (n_bt, d_out_p // tn_eff, pl.cdiv(d_in, tk_eff))

        out_p = pl.pallas_call(
            functools.partial(lr_kernel_tiled, d_in=d_in, tk=tk_eff),
            out_shape=jax.ShapeDtypeStruct((b, d_out_p), x.dtype),
            grid_spec=pltpu.PrefetchScalarGridSpec(
                num_scalar_prefetch=0,
                grid=grid,
                in_specs=[
                    pl.BlockSpec((tm_eff, tk_eff), lambda i, j, k: (i, k)),
                    pl.BlockSpec((tk_eff, tn_eff), lambda i, j, k: (k, j)),
                    pl.BlockSpec((1, tn_eff), lambda i, j, k: (0, j)),
                ],
                out_specs=pl.BlockSpec((tm_eff, tn_eff), lambda i, j, k: (i, j)),
                scratch_shapes=[pltpu.VMEM((tm_eff, tn_eff), jnp.float32)],
            ),
            compiler_params=pltpu.CompilerParams(
                dimension_semantics=("parallel", "parallel", "arbitrary"),
                vmem_limit_bytes=32 << 20,
            ),
        )(x2, w_t, b_row)

    if d_out_p != out_features:
        out_p = out_p[:, :out_features]
    return out_p


def init_linear_params(key, input_size, output_size, dtype=jnp.float32):
    # nn.Linear default init: U(-1/sqrt(in), 1/sqrt(in)).
    kw, kb = jax.random.split(key)
    bound = 1.0 / (float(input_size) ** 0.5)
    weight = jax.random.uniform(
        kw, (output_size, input_size), dtype, minval=-bound, maxval=bound
    )
    bias = jax.random.uniform(
        kb, (output_size,), dtype, minval=-bound, maxval=bound
    )
    return weight, bias


if __name__ == "__main__":
    key = jax.random.PRNGKey(0)
    k_x, k_p = jax.random.split(key)

    batch, input_size, output_size = 8, 32, 4
    # Input carries a singleton middle dim, as the module's .squeeze() implies.
    x = jax.random.normal(k_x, (batch, 1, input_size), dtype=jnp.float32)

    weight, bias = init_linear_params(k_p, input_size, output_size)

    # One-time parameter prep (transpose + lane-dense padding + bf16 cast).
    w_t, b_row, d_out = prepare_params(weight, bias)  # bf16 by default

    # Cast activations to bf16 once, outside the forward path.
    x_bf = x.astype(jnp.bfloat16)

    out = lr_forward(x_bf, w_t, b_row, out_features=d_out)
    out = jax.block_until_ready(out)

    # Reference built from the same bf16-rounded operands, f32 math.
    x_ref = x_bf.reshape(batch, input_size).astype(jnp.float32)
    w_ref = w_t[:, :d_out].astype(jnp.float32)
    ref = x_ref @ w_ref + bias

    assert out.shape == (batch, output_size), out.shape
    assert jnp.allclose(out.astype(jnp.float32), ref, atol=2e-2, rtol=2e-2), (
        "mismatch vs reference"
    )

    print("KERNEL_OK")
</pallas_src>

<mosaic_0001>
module attributes {stable_mosaic.version = 11 : i64} {
  func.func @lr_kernel_resident(%arg0: i32, %arg1: memref<8x32xbf16, #tpu.memory_space<vmem>>, %arg2: memref<32x128xbf16, #tpu.memory_space<vmem>>, %arg3: memref<1x128xf32, #tpu.memory_space<vmem>>, %arg4: memref<8x128xbf16, #tpu.memory_space<vmem>>) attributes {dimension_semantics = [#tpu.dimension_semantics<parallel>], iteration_bounds = array<i64: 1>, scalar_prefetch = 0 : i64, scratch_operands = 0 : i64, tpu.core_type = #tpu.core_type<tc>, window_params = [{transform_indices = @transform_0, window_bounds = array<i64: 8, 32>}, {pipeline_mode = #tpu.pipeline_mode<synchronous>, transform_indices = @transform_1, window_bounds = array<i64: 32, 128>}, {pipeline_mode = #tpu.pipeline_mode<synchronous>, transform_indices = @transform_2, window_bounds = array<i64: 1, 128>}, {transform_indices = @transform_3, window_bounds = array<i64: 8, 128>}]} {
    %c0 = arith.constant 0 : index
    %c0_0 = arith.constant 0 : index
    %0 = vector.load %arg1[%c0, %c0_0] : memref<8x32xbf16, #tpu.memory_space<vmem>>, vector<8x32xbf16>
    %c0_1 = arith.constant 0 : index
    %c0_2 = arith.constant 0 : index
    %1 = vector.load %arg2[%c0_1, %c0_2] : memref<32x128xbf16, #tpu.memory_space<vmem>>, vector<32x128xbf16>
    %cst = arith.constant dense<0.000000e+00> : vector<8x128xf32>
    %2 = tpu.matmul %0, %1, %cst {dimension_numbers = #tpu.dot_dimension_numbers<[1], [0], [0], [1], [0, 0, 1, 1], [], []>} : vector<8x32xbf16>, vector<32x128xbf16>, vector<8x128xf32> -> vector<8x128xf32>
    %c0_3 = arith.constant 0 : index
    %c0_4 = arith.constant 0 : index
    %3 = vector.load %arg3[%c0_3, %c0_4] : memref<1x128xf32, #tpu.memory_space<vmem>>, vector<1x128xf32>
    %4 = vector.broadcast %3 : vector<1x128xf32> to vector<8x128xf32>
    %5 = arith.addf %2, %4 : vector<8x128xf32>
    %6 = arith.truncf %5 : vector<8x128xf32> to vector<8x128xbf16>
    %c0_5 = arith.constant 0 : index
    %c0_6 = arith.constant 0 : index
    %7 = vector.load %arg4[%c0_5, %c0_6] : memref<8x128xbf16, #tpu.memory_space<vmem>>, vector<8x128xbf16>
    tpu.vector_store %arg4[%c0_5, %c0_6], %6 {strides = array<i32>} : memref<8x128xbf16, #tpu.memory_space<vmem>>, vector<8x128xbf16>,
    return
  }
  func.func @transform_0(%arg0: i32) -> (i32, i32) {
    %c0_i32 = arith.constant 0 : i32
    %c0_i32_0 = arith.constant 0 : i32
    return %arg0, %c0_i32 : i32, i32
  }
  func.func @transform_1(%arg0: i32) -> (i32, i32) {
    %c0_i32 = arith.constant 0 : i32
    %c0_i32_0 = arith.constant 0 : i32
    %c0_i32_1 = arith.constant 0 : i32
    return %c0_i32, %c0_i32_0 : i32, i32
  }
  func.func @transform_2(%arg0: i32) -> (i32, i32) {
    %c0_i32 = arith.constant 0 : i32
    %c0_i32_0 = arith.constant 0 : i32
    %c0_i32_1 = arith.constant 0 : i32
    return %c0_i32, %c0_i32_0 : i32, i32
  }
  func.func @transform_3(%arg0: i32) -> (i32, i32) {
    %c0_i32 = arith.constant 0 : i32
    %c0_i32_0 = arith.constant 0 : i32
    return %arg0, %c0_i32 : i32, i32
  }
}

</mosaic_0001>

<bundles_post_ra>
// kernel: lr_forward.1
= control target key start
LH: loop header
LB: loop body
LE: loop exit
PB: predicated region body
PF: predicated region fallthrough
CT: control target
= control target key end

     0   :  { %8 = vsyncpa [#allocation3], 0  ;;  %s222_s0 = inlined_call_operand.hbm [shape: bf16[8,32], index: 0, kind: input, shape index: {}]   ;;  %s223_s1 = inlined_call_operand.hbm [shape: bf16[32,128], index: 1, kind: input, shape index: {}]   ;;  %s224_s2 = inlined_call_operand.vmem [shape: f32[1,128], index: 2, kind: input, shape index: {}]   ;;  %s225_s3 = inlined_call_operand.vmem [shape: bf16[8,128], index: 3, kind: output, shape index: {}]  }
   0x1   :  { %9 = vsyncpa [#allocation5], 0  ;;  %s184_s12 = smov [#allocation2]   ;;  %s185_s14 = smov [#allocation4]  }
   0x2   :  { %s16_s13 = sshll.u32 %s184_s12, 4  ;;  %s25_s15 = sshll.u32 %s185_s14, 4  ;;  %s17_s13 = int_to_ptr.vmem [resolvable:$true] %s16_s13  ;;  %s26_s15 = int_to_ptr.vmem [resolvable:$true] %s25_s15 }
   0x3   :  { %s148_s16 = scalar_lea.vmem %s17_s13, 64  ;;  %p153_p1 = scmp.lt.s32.totalorder %s17_s13, %s17_s13 }
   0x4   :  { %p149_p0 = scmp.ne.s32.totalorder %s17_s13, %s148_s16  ;;  %p154_p2 = scmp.lt.s32.totalorder %s148_s16, %s148_s16 }
   0x6   :  { %p155_p3 = por %p154_p2, %p153_p1 }
   0x8   :  { %p156_p4 = pnand %p155_p3, %p149_p0 }
   0xa   :  { %159 = shalt.err (!%p156_p4)
}
   0xb   :  { %19 = dma.hbm_to_vmem [thread:$0]  %s222_s0, 64, %s17_s13, [#allocation3]  }
   0xc   :  { %s168_s19 = scalar_lea.vmem %s26_s15, 256  ;;  %p173_p6 = scmp.lt.s32.totalorder %s26_s15, %s26_s15 }
   0xd   :  { %p169_p5 = scmp.ne.s32.totalorder %s26_s15, %s168_s19  ;;  %p174_p7 = scmp.lt.s32.totalorder %s168_s19, %s168_s19 }
   0xf   :  { %p175_p8 = por %p174_p7, %p173_p6 }
  0x11   :  { %p176_p9 = pnand %p175_p8, %p169_p5 }
  0x13   :  { %179 = shalt.err (!%p176_p9)
}
  0x14   :  { %s186_s20 = smov 64   ;;  %s187_s21 = smov 4  }
  0x15   :  { %31 = dma.hbm_to_vmem [thread:$0]  %s223_s1, 256, %s26_s15, [#allocation5], %s186_s20, %s186_s20, %s187_s21  }
  0x16   :  { %180 = dma.done.wait [#allocation3], 64  }
  0x17   :  { %181 = vsyncadd [#allocation3], 4294967232 }
  0x18   :  { %182 = dma.done.wait [#allocation5], 256  }
  0x19   :  { %183 = vsyncadd [#allocation5], 4294967040  ;;  %v188_v0 = vmov 0.0   ;;  %vm189_vm0 = vmmov 0   ;;  %v138_v1 = vld [vmem:[#allocation4 + $0x8] sm:$0xff]   ;;  %v139_v2 = vld [vmem:[#allocation4] sm:$0xff]  }
  0x1a   :  { %124 = vmatprep.subr.bf16.mxu0 %v188_v0  ;;  %128 = vmatprep.mubr.msk.bf16.mxu0 %vm189_vm0, %v188_v0  ;;  %v41_v3 = vld [vmem:[#allocation2] sm:$0xf]  ;;  %vm65_vm1 = vcmask 261120  }
  0x1b   :  { %125 = vmatpush3.bf16.msra.mxu0 %v138_v1  ;;  %v117_v4 = vld [vmem:[%s224_s2] ss:$0 sm:$0xff] }
  0x1c   :  { %126 = vmatprep.subr.bf16.mxu0 %v188_v0 }
  0x1f   :  { %127 = vmatpush3.bf16.msra.mxu0 %v139_v2 }
  0x22   :  { %129 = vmatmul.mubr.msk.bf16.vlgmr.msra.gmra.mxu0 %vm65_vm1, %v41_v3 }
  0xe2   :  { %v103_v5 = vpop.f32.mrf.mxu0 }
  0xe3   :  { %v104_v6 = vadd.f32 %v117_v4, %v103_v5 }
  0xe4   :  { %v130_v7 = vpop.f32.mrf.mxu0 }
  0xe5   :  { %v109_v8 = vpack.c.bf16 %v104_v6, %v104_v6 }
  0xe6   :  { %v106_v9 = vpop.f32.mrf.mxu0 }
  0xe7   :  { %110 = vst [vmem:[%s225_s3] sm:$0xf] %v109_v8 }
  0xe8   :  { %v131_v10 = vpop.f32.mrf.mxu0 }
  0xe9   :  { %115 = vsyncpa [#allocation3], 1 }
  0xea   :  { %116 = vsyncpa [#allocation5], 1 }

</bundles_post_ra>
